<compile_context>
chip_gen: v6e
topology: v6e:2x2x1
jax: 0.10.0
libtpu: 0.0.40
codegen_flags: <defaults>
</compile_context>

<pallas_src>
import jax
import jax.numpy as jnp
from jax.experimental import pallas as pl
from jax.experimental.pallas import tpu as pltpu


def _round_up(v, m):
    return (v + m - 1) // m * m


def graph_embedding_kernel(x_ref, a_ref,
                           w1_root_ref, w1_rel_ref, b1_ref,
                           w2_root_ref, w2_rel_ref, b2_ref,
                           w_att_ref, out_ref):
    # Per-graph blocks: x (1, N, Fp) f32, a (1, N, N) bf16 raw edge counts.
    x = x_ref[0]                                   # (N, Fp)
    a = a_ref[0]                                   # (N, N) bf16, exact small ints

    # Mean aggregation = diag(1/deg) @ A ; fuse the normalization here instead of
    # materializing a normalized A in HBM.  deg from exact counts, f32.
    deg = jnp.sum(a.astype(jnp.float32), axis=-1, keepdims=True)      # (N, 1)
    inv_deg = pl.reciprocal(jnp.maximum(deg, 1.0), approx=True)       # EUP, ~free

    # ---- RGCNConv layer 1 (single relation) ----
    msg1 = jnp.dot(x, w1_rel_ref[...], preferred_element_type=jnp.float32)
    agg1 = jnp.dot(a, msg1.astype(jnp.bfloat16),
                   preferred_element_type=jnp.float32) * inv_deg
    h = (jnp.dot(x, w1_root_ref[...], preferred_element_type=jnp.float32)
         + agg1 + b1_ref[...])
    h = jnp.maximum(h, 0.0)                        # relu (elementwise kept f32)
    # dropout(p=args.dropout): eval mode -> identity

    # ---- RGCNConv layer 2 ----
    msg2 = jnp.dot(h, w2_rel_ref[...], preferred_element_type=jnp.float32)
    agg2 = jnp.dot(a, msg2.astype(jnp.bfloat16),
                   preferred_element_type=jnp.float32) * inv_deg
    h = (jnp.dot(h, w2_root_ref[...], preferred_element_type=jnp.float32)
         + agg2 + b2_ref[...])

    # ---- AttentionModule (SimGNN-style) ----
    # mean is linear -> hoist it before the W_att matmul: (1,Hp) @ (Hp,Hp) matvec
    mean_h = jnp.mean(h, axis=0, keepdims=True)                        # (1, Hp)
    ctx = jnp.tanh(jnp.dot(mean_h, w_att_ref[...],
                           preferred_element_type=jnp.float32))        # (1, Hp)
    scores = jax.nn.sigmoid(jnp.sum(h * ctx, axis=1, keepdims=True))   # (N, 1)
    # representation = h^T @ scores, written lane-dense as (1, Hp)
    out_ref[0] = jnp.sum(h * scores, axis=0, keepdims=True)


def init_params(key, num_features, nhid):
    ks = jax.random.split(key, 7)
    s = 0.1
    return {
        "w1_root": s * jax.random.normal(ks[0], (num_features, nhid), jnp.float32),
        "w1_rel":  s * jax.random.normal(ks[1], (num_features, nhid), jnp.float32),
        "b1":      s * jax.random.normal(ks[2], (1, nhid), jnp.float32),
        "w2_root": s * jax.random.normal(ks[3], (nhid, nhid), jnp.float32),
        "w2_rel":  s * jax.random.normal(ks[4], (nhid, nhid), jnp.float32),
        "b2":      s * jax.random.normal(ks[5], (1, nhid), jnp.float32),
        "w_att":   s * jax.random.normal(ks[6], (nhid, nhid), jnp.float32),
    }


def _pad2(w, rows, cols):
    r, c = w.shape
    return jnp.zeros((rows, cols), jnp.float32).at[:r, :c].set(w.astype(jnp.float32))


def graph_embedding(x, edge_index, params):
    """Batched forward.

    x:          (B, N, num_features) float32  — node features per graph
    edge_index: (B, 2, E) int32               — edges per graph (src; dst)
    returns:    (B, nhid, 1) float32          — pooled embedding per graph
    """
    B, N, F = x.shape
    nhid = params["w1_root"].shape[1]
    assert N % 8 == 0, "node count must be a multiple of 8 (sublane axis)"

    Fp = _round_up(F, 128)
    Hp = _round_up(nhid, 128)

    # Zero-pad feature / hidden dims to fill the 128-lane axis.
    xp = jnp.zeros((B, N, Fp), jnp.float32).at[:, :, :F].set(x.astype(jnp.float32))
    w1_root = _pad2(params["w1_root"], Fp, Hp)
    w1_rel = _pad2(params["w1_rel"], Fp, Hp)
    b1 = _pad2(params["b1"], 1, Hp)
    w2_root = _pad2(params["w2_root"], Hp, Hp)
    w2_rel = _pad2(params["w2_rel"], Hp, Hp)
    b2 = _pad2(params["b2"], 1, Hp)
    w_att = _pad2(params["w_att"], Hp, Hp)

    # Dense per-graph adjacency with RAW edge counts (messages flow src -> dst);
    # normalization (aggr='mean', deg clamped >= 1) is fused inside the kernel.
    # Counts are small integers -> exact in bf16 (halves VMEM/HBM for the N^2 term).
    src = edge_index[:, 0, :]                              # (B, E)
    dst = edge_index[:, 1, :]                              # (B, E)
    b_idx = jnp.broadcast_to(jnp.arange(B)[:, None], src.shape)
    adj = jnp.zeros((B, N, N), jnp.float32).at[b_idx, dst, src].add(1.0)
    adj = adj.astype(jnp.bfloat16)

    pooled = pl.pallas_call(
        graph_embedding_kernel,
        out_shape=jax.ShapeDtypeStruct((B, 1, Hp), jnp.float32),
        grid=(B,),
        in_specs=[
            pl.BlockSpec((1, N, Fp), lambda b: (b, 0, 0)),   # per-graph X
            pl.BlockSpec((1, N, N), lambda b: (b, 0, 0)),    # per-graph A counts
            pl.BlockSpec((Fp, Hp), lambda b: (0, 0)),        # W1_root (resident)
            pl.BlockSpec((Fp, Hp), lambda b: (0, 0)),        # W1_rel  (resident)
            pl.BlockSpec((1, Hp), lambda b: (0, 0)),         # b1
            pl.BlockSpec((Hp, Hp), lambda b: (0, 0)),        # W2_root (resident)
            pl.BlockSpec((Hp, Hp), lambda b: (0, 0)),        # W2_rel  (resident)
            pl.BlockSpec((1, Hp), lambda b: (0, 0)),         # b2
            pl.BlockSpec((Hp, Hp), lambda b: (0, 0)),        # W_att   (resident)
        ],
        out_specs=pl.BlockSpec((1, 1, Hp), lambda b: (b, 0, 0)),
        compiler_params=pltpu.CompilerParams(
            dimension_semantics=("parallel",)),              # shard graphs over TCs
    )(xp, adj, w1_root, w1_rel, b1, w2_root, w2_rel, b2, w_att)

    # Lane-dense (B, 1, Hp) slab -> (B, nhid, 1), matching torch.mm(h.t(), scores).
    return pooled[:, 0, :nhid][:, :, None]


if __name__ == "__main__":
    B = 8               # graphs per batch (one grid step each)
    N = 16              # nodes per graph (multiple of 8)
    E = 48              # edges per graph
    NUM_FEATURES = 32   # args.num_features
    NHID = 32           # args.nhid

    key = jax.random.PRNGKey(0)
    k_x, k_e, k_p = jax.random.split(key, 3)

    x = jax.random.normal(k_x, (B, N, NUM_FEATURES), jnp.float32)
    edge_index = jax.random.randint(k_e, (B, 2, E), 0, N, dtype=jnp.int32)
    params = init_params(k_p, NUM_FEATURES, NHID)

    out = graph_embedding(x, edge_index, params)
    jax.block_until_ready(out)
    assert out.shape == (B, NHID, 1)
    print("KERNEL_OK")
</pallas_src>

<mosaic_0001>
module attributes {stable_mosaic.version = 11 : i64} {
  func.func @graph_embedding_kernel(%arg0: i32, %arg1: memref<1x16x128xf32, #tpu.memory_space<vmem>>, %arg2: memref<1x16x16xbf16, #tpu.memory_space<vmem>>, %arg3: memref<128x128xf32, #tpu.memory_space<vmem>>, %arg4: memref<128x128xf32, #tpu.memory_space<vmem>>, %arg5: memref<1x128xf32, #tpu.memory_space<vmem>>, %arg6: memref<128x128xf32, #tpu.memory_space<vmem>>, %arg7: memref<128x128xf32, #tpu.memory_space<vmem>>, %arg8: memref<1x128xf32, #tpu.memory_space<vmem>>, %arg9: memref<128x128xf32, #tpu.memory_space<vmem>>, %arg10: memref<1x1x128xf32, #tpu.memory_space<vmem>>) attributes {dimension_semantics = [#tpu.dimension_semantics<parallel>], iteration_bounds = array<i64: 8>, scalar_prefetch = 0 : i64, scratch_operands = 0 : i64, tpu.core_type = #tpu.core_type<tc>, window_params = [{transform_indices = @transform_0, window_bounds = array<i64: 1, 16, 128>}, {transform_indices = @transform_1, window_bounds = array<i64: 1, 16, 16>}, {pipeline_mode = #tpu.pipeline_mode<synchronous>, transform_indices = @transform_2, window_bounds = array<i64: 128, 128>}, {pipeline_mode = #tpu.pipeline_mode<synchronous>, transform_indices = @transform_3, window_bounds = array<i64: 128, 128>}, {pipeline_mode = #tpu.pipeline_mode<synchronous>, transform_indices = @transform_4, window_bounds = array<i64: 1, 128>}, {pipeline_mode = #tpu.pipeline_mode<synchronous>, transform_indices = @transform_5, window_bounds = array<i64: 128, 128>}, {pipeline_mode = #tpu.pipeline_mode<synchronous>, transform_indices = @transform_6, window_bounds = array<i64: 128, 128>}, {pipeline_mode = #tpu.pipeline_mode<synchronous>, transform_indices = @transform_7, window_bounds = array<i64: 1, 128>}, {pipeline_mode = #tpu.pipeline_mode<synchronous>, transform_indices = @transform_8, window_bounds = array<i64: 128, 128>}, {transform_indices = @transform_9, window_bounds = array<i64: 1, 1, 128>}]} {
    %c0 = arith.constant 0 : index
    %c0_0 = arith.constant 0 : index
    %c0_1 = arith.constant 0 : index
    %0 = vector.load %arg1[%c0, %c0_0, %c0_1] : memref<1x16x128xf32, #tpu.memory_space<vmem>>, vector<1x16x128xf32>
    %1 = vector.shape_cast %0 : vector<1x16x128xf32> to vector<16x128xf32>
    %c0_2 = arith.constant 0 : index
    %c0_3 = arith.constant 0 : index
    %c0_4 = arith.constant 0 : index
    %2 = vector.load %arg2[%c0_2, %c0_3, %c0_4] : memref<1x16x16xbf16, #tpu.memory_space<vmem>>, vector<1x16x16xbf16>
    %3 = vector.shape_cast %2 : vector<1x16x16xbf16> to vector<16x16xbf16>
    %4 = arith.extf %3 : vector<16x16xbf16> to vector<16x16xf32>
    %cst = arith.constant dense<0.000000e+00> : vector<16xf32>
    %5 = vector.multi_reduction <add>, %4, %cst [1] : vector<16x16xf32> to vector<16xf32>
    %6 = vector.shape_cast %5 : vector<16xf32> to vector<16x1xf32>
    %cst_5 = arith.constant 1.000000e+00 : f32
    %7 = vector.broadcast %cst_5 : f32 to vector<16x1xf32>
    %8 = arith.maximumf %6, %7 : vector<16x1xf32>
    %9 = tpu.reciprocal %8 {approx = true} : vector<16x1xf32> -> vector<16x1xf32>
    %c0_6 = arith.constant 0 : index
    %c0_7 = arith.constant 0 : index
    %10 = vector.load %arg4[%c0_6, %c0_7] : memref<128x128xf32, #tpu.memory_space<vmem>>, vector<128x128xf32>
    %cst_8 = arith.constant dense<0.000000e+00> : vector<16x128xf32>
    %11 = tpu.matmul %1, %10, %cst_8 {dimension_numbers = #tpu.dot_dimension_numbers<[1], [0], [0], [1], [0, 0, 1, 1], [], []>} : vector<16x128xf32>, vector<128x128xf32>, vector<16x128xf32> -> vector<16x128xf32>
    %12 = arith.truncf %11 : vector<16x128xf32> to vector<16x128xbf16>
    %cst_9 = arith.constant dense<0.000000e+00> : vector<16x128xf32>
    %13 = tpu.matmul %3, %12, %cst_9 {dimension_numbers = #tpu.dot_dimension_numbers<[1], [0], [0], [1], [0, 0, 1, 1], [], []>} : vector<16x16xbf16>, vector<16x128xbf16>, vector<16x128xf32> -> vector<16x128xf32>
    %14 = vector.broadcast %9 : vector<16x1xf32> to vector<16x128xf32>
    %15 = arith.mulf %13, %14 : vector<16x128xf32>
    %c0_10 = arith.constant 0 : index
    %c0_11 = arith.constant 0 : index
    %16 = vector.load %arg3[%c0_10, %c0_11] : memref<128x128xf32, #tpu.memory_space<vmem>>, vector<128x128xf32>
    %cst_12 = arith.constant dense<0.000000e+00> : vector<16x128xf32>
    %17 = tpu.matmul %1, %16, %cst_12 {dimension_numbers = #tpu.dot_dimension_numbers<[1], [0], [0], [1], [0, 0, 1, 1], [], []>} : vector<16x128xf32>, vector<128x128xf32>, vector<16x128xf32> -> vector<16x128xf32>
    %18 = arith.addf %17, %15 : vector<16x128xf32>
    %c0_13 = arith.constant 0 : index
    %c0_14 = arith.constant 0 : index
    %19 = vector.load %arg5[%c0_13, %c0_14] : memref<1x128xf32, #tpu.memory_space<vmem>>, vector<1x128xf32>
    %20 = vector.broadcast %19 : vector<1x128xf32> to vector<16x128xf32>
    %21 = arith.addf %18, %20 : vector<16x128xf32>
    %cst_15 = arith.constant 0.000000e+00 : f32
    %22 = vector.broadcast %cst_15 : f32 to vector<16x128xf32>
    %23 = arith.maximumf %21, %22 : vector<16x128xf32>
    %c0_16 = arith.constant 0 : index
    %c0_17 = arith.constant 0 : index
    %24 = vector.load %arg7[%c0_16, %c0_17] : memref<128x128xf32, #tpu.memory_space<vmem>>, vector<128x128xf32>
    %cst_18 = arith.constant dense<0.000000e+00> : vector<16x128xf32>
    %25 = tpu.matmul %23, %24, %cst_18 {dimension_numbers = #tpu.dot_dimension_numbers<[1], [0], [0], [1], [0, 0, 1, 1], [], []>} : vector<16x128xf32>, vector<128x128xf32>, vector<16x128xf32> -> vector<16x128xf32>
    %26 = arith.truncf %25 : vector<16x128xf32> to vector<16x128xbf16>
    %cst_19 = arith.constant dense<0.000000e+00> : vector<16x128xf32>
    %27 = tpu.matmul %3, %26, %cst_19 {dimension_numbers = #tpu.dot_dimension_numbers<[1], [0], [0], [1], [0, 0, 1, 1], [], []>} : vector<16x16xbf16>, vector<16x128xbf16>, vector<16x128xf32> -> vector<16x128xf32>
    %28 = vector.broadcast %9 : vector<16x1xf32> to vector<16x128xf32>
    %29 = arith.mulf %27, %28 : vector<16x128xf32>
    %c0_20 = arith.constant 0 : index
    %c0_21 = arith.constant 0 : index
    %30 = vector.load %arg6[%c0_20, %c0_21] : memref<128x128xf32, #tpu.memory_space<vmem>>, vector<128x128xf32>
    %cst_22 = arith.constant dense<0.000000e+00> : vector<16x128xf32>
    %31 = tpu.matmul %23, %30, %cst_22 {dimension_numbers = #tpu.dot_dimension_numbers<[1], [0], [0], [1], [0, 0, 1, 1], [], []>} : vector<16x128xf32>, vector<128x128xf32>, vector<16x128xf32> -> vector<16x128xf32>
    %32 = arith.addf %31, %29 : vector<16x128xf32>
    %c0_23 = arith.constant 0 : index
    %c0_24 = arith.constant 0 : index
    %33 = vector.load %arg8[%c0_23, %c0_24] : memref<1x128xf32, #tpu.memory_space<vmem>>, vector<1x128xf32>
    %34 = vector.broadcast %33 : vector<1x128xf32> to vector<16x128xf32>
    %35 = arith.addf %32, %34 : vector<16x128xf32>
    %cst_25 = arith.constant dense<0.000000e+00> : vector<128xf32>
    %36 = vector.multi_reduction <add>, %35, %cst_25 [0] : vector<16x128xf32> to vector<128xf32>
    %37 = vector.shape_cast %36 : vector<128xf32> to vector<1x128xf32>
    %cst_26 = arith.constant 1.600000e+01 : f32
    %38 = vector.broadcast %cst_26 : f32 to vector<1x128xf32>
    %39 = arith.divf %37, %38 : vector<1x128xf32>
    %c0_27 = arith.constant 0 : index
    %c0_28 = arith.constant 0 : index
    %40 = vector.load %arg9[%c0_27, %c0_28] : memref<128x128xf32, #tpu.memory_space<vmem>>, vector<128x128xf32>
    %cst_29 = arith.constant dense<0.000000e+00> : vector<1x128xf32>
    %41 = tpu.matmul %39, %40, %cst_29 {dimension_numbers = #tpu.dot_dimension_numbers<[1], [0], [0], [1], [0, 0, 1, 1], [], []>} : vector<1x128xf32>, vector<128x128xf32>, vector<1x128xf32> -> vector<1x128xf32>
    %42 = math.tanh %41 : vector<1x128xf32>
    %43 = vector.broadcast %42 : vector<1x128xf32> to vector<16x128xf32>
    %44 = arith.mulf %35, %43 : vector<16x128xf32>
    %cst_30 = arith.constant dense<0.000000e+00> : vector<16xf32>
    %45 = vector.multi_reduction <add>, %44, %cst_30 [1] : vector<16x128xf32> to vector<16xf32>
    %46 = vector.shape_cast %45 : vector<16xf32> to vector<16x1xf32>
    %47 = arith.negf %46 : vector<16x1xf32>
    %48 = math.exp %47 : vector<16x1xf32>
    %cst_31 = arith.constant 1.000000e+00 : f32
    %49 = vector.broadcast %cst_31 : f32 to vector<16x1xf32>
    %50 = arith.addf %49, %48 : vector<16x1xf32>
    %51 = arith.divf %49, %50 : vector<16x1xf32>
    %52 = vector.broadcast %51 : vector<16x1xf32> to vector<16x128xf32>
    %53 = arith.mulf %35, %52 : vector<16x128xf32>
    %cst_32 = arith.constant dense<0.000000e+00> : vector<128xf32>
    %54 = vector.multi_reduction <add>, %53, %cst_32 [0] : vector<16x128xf32> to vector<128xf32>
    %55 = vector.shape_cast %54 : vector<128xf32> to vector<1x128xf32>
    %c0_33 = arith.constant 0 : index
    %c0_34 = arith.constant 0 : index
    %c0_35 = arith.constant 0 : index
    %56 = vector.load %arg10[%c0_33, %c0_34, %c0_35] : memref<1x1x128xf32, #tpu.memory_space<vmem>>, vector<1x1x128xf32>
    %57 = vector.shape_cast %56 : vector<1x1x128xf32> to vector<1x128xf32>
    %58 = vector.shape_cast %55 : vector<1x128xf32> to vector<1x1x128xf32>
    tpu.vector_store %arg10[%c0_33, %c0_34, %c0_35], %58 {strides = array<i32>} : memref<1x1x128xf32, #tpu.memory_space<vmem>>, vector<1x1x128xf32>,
    return
  }
  func.func @transform_0(%arg0: i32) -> (i32, i32, i32) {
    %c0_i32 = arith.constant 0 : i32
    %c0_i32_0 = arith.constant 0 : i32
    %c0_i32_1 = arith.constant 0 : i32
    return %arg0, %c0_i32, %c0_i32_0 : i32, i32, i32
  }
  func.func @transform_1(%arg0: i32) -> (i32, i32, i32) {
    %c0_i32 = arith.constant 0 : i32
    %c0_i32_0 = arith.constant 0 : i32
    %c0_i32_1 = arith.constant 0 : i32
    return %arg0, %c0_i32, %c0_i32_0 : i32, i32, i32
  }
  func.func @transform_2(%arg0: i32) -> (i32, i32) {
    %c0_i32 = arith.constant 0 : i32
    %c0_i32_0 = arith.constant 0 : i32
    %c0_i32_1 = arith.constant 0 : i32
    return %c0_i32, %c0_i32_0 : i32, i32
  }
  func.func @transform_3(%arg0: i32) -> (i32, i32) {
    %c0_i32 = arith.constant 0 : i32
    %c0_i32_0 = arith.constant 0 : i32
    %c0_i32_1 = arith.constant 0 : i32
    return %c0_i32, %c0_i32_0 : i32, i32
  }
  func.func @transform_4(%arg0: i32) -> (i32, i32) {
    %c0_i32 = arith.constant 0 : i32
    %c0_i32_0 = arith.constant 0 : i32
    %c0_i32_1 = arith.constant 0 : i32
    return %c0_i32, %c0_i32_0 : i32, i32
  }
  func.func @transform_5(%arg0: i32) -> (i32, i32) {
    %c0_i32 = arith.constant 0 : i32
    %c0_i32_0 = arith.constant 0 : i32
    %c0_i32_1 = arith.constant 0 : i32
    return %c0_i32, %c0_i32_0 : i32, i32
  }
  func.func @transform_6(%arg0: i32) -> (i32, i32) {
    %c0_i32 = arith.constant 0 : i32
    %c0_i32_0 = arith.constant 0 : i32
    %c0_i32_1 = arith.constant 0 : i32
    return %c0_i32, %c0_i32_0 : i32, i32
  }
  func.func @transform_7(%arg0: i32) -> (i32, i32) {
    %c0_i32 = arith.constant 0 : i32
    %c0_i32_0 = arith.constant 0 : i32
    %c0_i32_1 = arith.constant 0 : i32
    return %c0_i32, %c0_i32_0 : i32, i32
  }
  func.func @transform_8(%arg0: i32) -> (i32, i32) {
    %c0_i32 = arith.constant 0 : i32
    %c0_i32_0 = arith.constant 0 : i32
    %c0_i32_1 = arith.constant 0 : i32
    return %c0_i32, %c0_i32_0 : i32, i32
  }
  func.func @transform_9(%arg0: i32) -> (i32, i32, i32) {
    %c0_i32 = arith.constant 0 : i32
    %c0_i32_0 = arith.constant 0 : i32
    %c0_i32_1 = arith.constant 0 : i32
    return %arg0, %c0_i32, %c0_i32_0 : i32, i32, i32
  }
}

</mosaic_0001>

<bundles_post_ra>
// kernel: tpu_custom_call.1
= control target key start
LH: loop header
LB: loop body
LE: loop exit
PB: predicated region body
PF: predicated region fallthrough
CT: control target
= control target key end

     0   :  { %s2356_s0 = inlined_call_operand.hbm [shape: f32[8,16,128], index: 0, kind: input, shape index: {}]   ;;  %s2357_s1 = inlined_call_operand.hbm [shape: bf16[8,16,16], index: 1, kind: input, shape index: {}]   ;;  %s2358_s2 = inlined_call_operand.hbm [shape: f32[128,128], index: 2, kind: input, shape index: {}]   ;;  %s2359_s3 = inlined_call_operand.hbm [shape: f32[128,128], index: 3, kind: input, shape index: {}]   ;;  %s2360_s4 = inlined_call_operand.vmem [shape: f32[1,128], index: 4, kind: input, shape index: {}]   ;;  %s2361_s5 = inlined_call_operand.hbm [shape: f32[128,128], index: 5, kind: input, shape index: {}]   ;;  %s2362_s6 = inlined_call_operand.hbm [shape: f32[128,128], index: 6, kind: input, shape index: {}]   ;;  %s2363_s7 = inlined_call_operand.vmem [shape: f32[1,128], index: 7, kind: input, shape index: {}]   ;;  %s2364_s8 = inlined_call_operand.hbm [shape: f32[128,128], index: 8, kind: input, shape index: {}]   ;;  %s2365_s9 = inlined_call_operand.hbm [shape: f32[8,1,128], index: 9, kind: output, shape index: {}]  }
   0x1   :  { %2371 = sst [smem:[#allocation22_spill]] %s2356_s0 }
   0x2   :  { %2372 = sst [smem:[#allocation23_spill]] %s2358_s2 }
   0x3   :  { %2373 = sst [smem:[#allocation24_spill]] %s2359_s3 }
   0x4   :  { %2374 = sst [smem:[#allocation25_spill]] %s2361_s5 }
   0x5   :  { %2375 = sst [smem:[#allocation26_spill]] %s2362_s6 }
   0x6   :  { %2376 = sst [smem:[#allocation27_spill]] %s2364_s8 }
   0x7   :  { %14 = vsyncpa [#allocation3], 0 }
   0x8   :  { %16 = vsyncpa [#allocation3 + $0x1], 0 }
   0x9   :  { %17 = vsyncpa [#allocation6], 0 }
   0xa   :  { %19 = vsyncpa [#allocation6 + $0x1], 0 }
   0xb   :  { %20 = vsyncpa [#allocation9], 0 }
   0xc   :  { %21 = vsyncpa [#allocation12], 0 }
   0xd   :  { %22 = vsyncpa [#allocation4], 0 }
   0xe   :  { %24 = vsyncpa [#allocation4 + $0x1], 0  ;;  %s2007_s30 = smov 0   ;;  %s2009_s10 = smov 0  }
   0xf   :  { %s2011_s11 = smov 0   ;;  %s2013_s12 = smov 0  }
  0x10 LB: > { %s1943_s13 = smov [#allocation7]   ;;  %s2028_s15 = sadd.s32 4294967295, %s1941_s12   ;;  %s1941_s12 = sphi %s2013_s12, %s2408_s12   ;;  %s1937_s11 = sphi %s2011_s11, %s2407_s11   ;;  %s1933_s10 = sphi %s2009_s10, %s2406_s10   ;;  %s1929_s30 = sphi %s2007_s30, %s2405_s30  }
  0x11   : > { %s272_s14 = sshll.u32 %s1943_s13, 4  ;;  %p1238_p0 = scmp.ge.s32.totalorder %s1941_s12, 1  ;;  %s273_s14 = int_to_ptr.vmem [resolvable:$true] %s272_s14 }
  0x12   : > { %p2368_p1 = scmp.eq.s32.totalorder %s2028_s15, 0  ;;  %p260_p2 = scmp.lt.s32.totalorder %s1941_s12, 9 }
  0x13   : > { %s1944_s17 = smov [#allocation8]   ;;  %s1945_s20 = smov [#allocation11]  }
  0x14   : > { %p2033_p3 = pnand %p1238_p0, %p260_p2  ;;  %s285_s18 = sshll.u32 %s1944_s17, 4  ;;  %s2045_s18 = int_to_ptr.vmem [resolvable:$true] %s285_s18 }
  0x15   : > { %s314_s21 = sshll.u32 %s1945_s20, 4  ;;  %s1686_s23 = scalar_lea.vmem %s273_s14, 2048  ;;  %s2047_s21 = int_to_ptr.vmem [resolvable:$true] %s314_s21 }
  0x16   : > { %p1577_p4 = pneg %p2033_p3  ;;  %p1687_p7 = scmp.ne.s32.totalorder %s273_s14, %s1686_s23 }
  0x17   : > { %p1694_p10 = scmp.lt.s32.totalorder %s273_s14, %s273_s14  ;;  %p1695_p11 = scmp.lt.s32.totalorder %s1686_s23, %s1686_s23 }
  0x18   : > { %p2041_p5 = pnand %p1577_p4, %p2368_p1 }
  0x19   : > { %p1696_p12 = por %p1695_p11, %p1694_p10 }
  0x1a   : > { %p2051_p6 = pneg %p2041_p5 }
  0x1c   : > { %p1689_p8 = pnand %p1687_p7, %p2051_p6 }
  0x1e   : > { %p1690_p9 = pneg %p1689_p8 }
  0x20   : > { %p1697_p13 = pnand %p1696_p12, %p1690_p9 }
  0x22   : > { %1700 = shalt.err (!%p1697_p13)
}
  0x23   : > { %s2366_s24 = smov 128   ;;  %s2367_s25 = smov 8  }
  0x24   : > { %s2380_s2 = sld [smem:[#allocation23_spill]]  ;;  %s1712_s28 = scalar_lea.vmem %s2045_s18, 2048 }
  0x25   : > { %p1713_p0 = scmp.ne.s32.totalorder %s2045_s18, %s1712_s28  ;;  %p1720_p7 = scmp.lt.s32.totalorder %s2045_s18, %s2045_s18 }
  0x26   : > { %p1721_p8 = scmp.lt.s32.totalorder %s1712_s28, %s1712_s28 }
  0x27   : > { %p1715_p2 = pnand %p1713_p0, %p2051_p6 }
  0x28   : > { %p1722_p9 = por %p1721_p8, %p1720_p7 }
  0x29   : > { %p1716_p4 = pneg %p1715_p2 }
  0x2a   : > { %1580 = dma.hbm_to_vmem [thread:$0]  (!%p2041_p5), %s2380_s2, 2048, %s273_s14, [#allocation6], %s2366_s24, %s2366_s24, %s2367_s25  }
  0x2b   : > { %p1723_p10 = pnand %p1722_p9, %p1716_p4 }
  0x2d   : > { %1726 = shalt.err (!%p1723_p10)
}
  0x2e   : > { %s2381_s3 = sld [smem:[#allocation24_spill]]  ;;  %s1738_s14 = scalar_lea.vmem %s2047_s21, 2048 }
  0x2f   : > { %p1739_p11 = scmp.ne.s32.totalorder %s2047_s21, %s1738_s14  ;;  %p1746_p0 = scmp.lt.s32.totalorder %s2047_s21, %s2047_s21 }
  0x30   : > { %p1747_p2 = scmp.lt.s32.totalorder %s1738_s14, %s1738_s14 }
  0x31   : > { %p1741_p12 = pnand %p1739_p11, %p2051_p6 }
  0x32   : > { %p1748_p4 = por %p1747_p2, %p1746_p0 }
  0x33   : > { %p1742_p13 = pneg %p1741_p12 }
  0x34   : > { %1583 = dma.hbm_to_vmem [thread:$0]  (!%p2041_p5), %s2381_s3, 2048, %s2045_s18, [#allocation9], %s2366_s24, %s2366_s24, %s2367_s25  }
  0x35   : > { %p1749_p7 = pnand %p1748_p4, %p1742_p13 }
  0x37   : > { %1752 = shalt.err (!%p1749_p7)
}
  0x38   : > { %s2382_s6 = sld [smem:[#allocation26_spill]]  ;;  %s1948_s18 = smov [#allocation10]  }
  0x39   : > { %s301_s23 = sshll.u32 %s1948_s18, 4  ;;  %s1949_s26 = smov [#allocation13]   ;;  %s302_s23 = int_to_ptr.vmem [resolvable:$true] %s301_s23 }
  0x3a   : > { %s330_s27 = sshll.u32 %s1949_s26, 4  ;;  %s1764_s28 = scalar_lea.vmem %s302_s23, 2048  ;;  %s331_s27 = int_to_ptr.vmem [resolvable:$true] %s330_s27 }
  0x3b   : > { %p1765_p8 = scmp.ne.s32.totalorder %s302_s23, %s1764_s28  ;;  %p1772_p11 = scmp.lt.s32.totalorder %s302_s23, %s302_s23 }
  0x3c   : > { %p1773_p12 = scmp.lt.s32.totalorder %s1764_s28, %s1764_s28 }
  0x3d   : > { %p1767_p9 = pnand %p1765_p8, %p2051_p6 }
  0x3e   : > { %1589 = dma.hbm_to_vmem [thread:$0]  (!%p2041_p5), %s2382_s6, 2048, %s2047_s21, [#allocation12], %s2366_s24, %s2366_s24, %s2367_s25  }
  0x3f   : > { %p1768_p10 = pneg %p1767_p9  ;;  %p1774_p13 = por %p1773_p12, %p1772_p11 }
  0x41   : > { %p1775_p0 = pnand %p1774_p13, %p1768_p10 }
  0x43   : > { %1778 = shalt.err (!%p1775_p0)
}
  0x44   : > { %s2383_s5 = sld [smem:[#allocation25_spill]]  ;;  %s1790_s13 = scalar_lea.vmem %s331_s27, 2048 }
  0x45   : > { %p1791_p2 = scmp.ne.s32.totalorder %s331_s27, %s1790_s13  ;;  %p1798_p8 = scmp.lt.s32.totalorder %s331_s27, %s331_s27 }
  0x46   : > { %p1799_p9 = scmp.lt.s32.totalorder %s1790_s13, %s1790_s13 }
  0x47   : > { %p1793_p4 = pnand %p1791_p2, %p2051_p6 }
  0x48   : > { %p1800_p10 = por %p1799_p9, %p1798_p8 }
  0x49   : > { %p1794_p7 = pneg %p1793_p4 }
  0x4a   : > { %1586 = dma.hbm_to_vmem [thread:$0]  (!%p2041_p5), %s2383_s5, 2048, %s302_s23, [#allocation9], %s2366_s24, %s2366_s24, %s2367_s25  }
  0x4b   : > { %p1801_p11 = pnand %p1800_p10, %p1794_p7 }
  0x4d   : > { %1804 = shalt.err (!%p1801_p11)
}
  0x4e   : > { %s2384_s8 = sld [smem:[#allocation27_spill]]  ;;  %s1237_s19 = sadd.s32 4294967294, %s1941_s12  }
  0x4f   : > { %s2117_s22 = sadd.s32 1, %s1941_s12   ;;  %s37_s20 = sadd.s32 1, %s1937_s11 }
  0x50   : > { %s34_s18 = ssub.s32 %s1941_s12, %s2117_s22  ;;  %p44_p6 = scmp.ne.s32.totalorder %s1937_s11, %s1933_s10 }
  0x51   : > { %p35_p12 = scmp.eq.s32.totalorder %s34_s18, 0  ;;  %p45_p13 = scmp.eq.s32.totalorder %s1941_s12, 0 }
  0x52   : > { %p50_p0 = scmp.ne.s32.totalorder %s1933_s10, %s1929_s30  ;;  %p247_p2 = scmp.eq.s32.totalorder %s2028_s15, 7 }
  0x53   : > { %s2129_s23 = scalar_select %p35_p12, %s1937_s11, %s37_s20  }
  0x54   : > { %1592 = dma.hbm_to_vmem [thread:$0]  (!%p2041_p5), %s2384_s8, 2048, %s331_s27, [#allocation12], %s2366_s24, %s2366_s24, %s2367_s25  }
  0x55   : > { %2385 = sst [smem:[#allocation21_spill]] %s2129_s23  ;;  %p46_p4 = por %p45_p13, %p44_p6 }
  0x56   : > { %p2133_p7 = por %p2368_p1, %p50_p0  ;;  %p2137_p5 = por %p247_p2, %p44_p6 }
  0x57   : > { %p253_p8 = scmp.eq.s32.totalorder %s1237_s19, 7  ;;  %p1609_p9 = scmp.lt.s32.totalorder %s1941_s12, 8 }
  0x58   : > { %s2386_s26 = scalar_select %p2133_p7, 1, 0 }
  0x59   : > { %s2387_s27 = scalar_select %p2137_p5, 1, 0 }
  0x5a   : > { %s2143_s28 = sand.u32 1, %s1937_s11   ;;  %p2145_p10 = por %p253_p8, %p50_p0 }
  0x5b   : > { %s1245_s29 = sshll.u32 %s2143_s28, 4  ;;  %s1269_s13 = sshll.u32 %s1941_s12, 8 }
  0x5c   : > { %s2388_s21 = scalar_select %p2145_p10, 1, 0 }
  0x5d   : > { %s2389_s0 = sld [smem:[#allocation22_spill]]  ;;  %s348_s19 = scalar_lea.vmem [#allocation2], %s1245_s29 }
  0x5e   : > { %s355_s18 = sshll.u32 %s348_s19, 4  ;;  %p2156_p11 = pnand %p1609_p9, %p46_p4  ;;  %s2160_s18 = int_to_ptr.vmem [resolvable:$true] %s355_s18 }
  0x60   : > { %p1807_p12 = pneg %p2156_p11 }
  0x63   : > { %s2154_s20 = scalar_lea.hbm %s2389_s0, %s1269_s13  ;;  %s1810_s14 = scalar_lea.hbm %s2389_s0, 2048 }
  0x64   : > { %s1805_s3 = scalar_lea.hbm %s2154_s20, 256  ;;  %p1811_p2 = scmp.lt.s32.totalorder %s2154_s20, %s2389_s0 }
  0x65   : > { %p1806_p6 = scmp.ne.s32.totalorder %s2154_s20, %s1805_s3  ;;  %p1812_p4 = scmp.lt.s32.totalorder %s1810_s14, %s1805_s3 }
  0x67   : > { %p1808_p13 = pnand %p1807_p12, %p1806_p6  ;;  %p1813_p8 = por %p1812_p4, %p1811_p2 }
  0x69   : > { %p1809_p0 = pneg %p1808_p13 }
  0x6b   : > { %p1814_p9 = pnand %p1813_p8, %p1809_p0 }
  0x6d   : > { %1817 = shalt.err (!%p1814_p9)
}
  0x6e   : > { %s1818_s25 = scalar_lea.vmem %s2160_s18, 256  ;;  %s1950_s29 = smov [#allocation2]  }
  0x6f   : > { %p1819_p1 = scmp.ne.s32.totalorder %s2160_s18, %s1818_s25  ;;  %s1823_s13 = sshll.u32 %s1950_s29, 4  ;;  %s1824_s13 = int_to_ptr.vmem [resolvable:$false] %s1823_s13 }
  0x70   : > { %s1825_s2 = scalar_lea.vmem %s1824_s13, 512  ;;  %p1826_p10 = scmp.lt.s32.totalorder %s2160_s18, %s1824_s13 }
  0x71   : > { %p1821_p6 = pnand %p1819_p1, %p1807_p12  ;;  %p1827_p5 = scmp.lt.s32.totalorder %s1825_s2, %s1818_s25 }
  0x73   : > { %p1822_p13 = pneg %p1821_p6  ;;  %p1828_p7 = por %p1827_p5, %p1826_p10 }
  0x75   : > { %p1829_p2 = pnand %p1828_p7, %p1822_p13 }
  0x77   : > { %1832 = shalt.err (!%p1829_p2)
}
  0x78   : > { %s2391_s3 = smov 8   ;;  %s2392_s14 = smov 128  }
  0x79   : > { %s2393_s17 = scalar_lea.sflag [#allocation3], %s2143_s28  ;;  %s1248_s19 = sshll.u32 %s2143_s28, 3 }
  0x7a   : > { %1596 = dma.hbm_to_vmem [thread:$0]  (!%p2156_p11), %s2154_s20, 256, %s2160_s18, %s2393_s17, %s2392_s14, %s2392_s14, %s2391_s3  }
  0x7b   : > { %s1270_s29 = sshll.u32 %s1941_s12, 7  ;;  %s369_s0 = scalar_lea.vmem [#allocation5], %s1248_s19 }
  0x7c   : > { %s2198_s13 = scalar_lea.hbm %s2357_s1, %s1270_s29  ;;  %s376_s5 = sshll.u32 %s369_s0, 4  ;;  %s2200_s5 = int_to_ptr.vmem [resolvable:$true] %s376_s5 }
  0x7d   : > { %s2394_s6 = sand.u32 1, %s1941_s12   ;;  %s1833_s23 = scalar_lea.hbm %s2198_s13, 128 }
  0x7e   : > { %s2204_s8 = scalar_lea.sflag [#allocation6], %s2394_s6  ;;  %p1834_p1 = scmp.ne.s32.totalorder %s2198_s13, %s1833_s23 }
  0x7f   : > { %s1838_s18 = scalar_lea.hbm %s2357_s1, 1024  ;;  %p1839_p10 = scmp.lt.s32.totalorder %s2198_s13, %s2357_s1 }
  0x80   : > { %p1836_p7 = pnand %p1834_p1, %p1807_p12  ;;  %p1840_p0 = scmp.lt.s32.totalorder %s1838_s18, %s1833_s23 }
  0x82   : > { %p1837_p5 = pneg %p1836_p7  ;;  %p1841_p4 = por %p1840_p0, %p1839_p10 }
  0x84   : > { %p1842_p8 = pnand %p1841_p4, %p1837_p5 }
  0x86   : > { %1845 = shalt.err (!%p1842_p8)
}
  0x87   : > { %s1846_s0 = scalar_lea.vmem %s2200_s5, 128  ;;  %s1951_s6 = smov [#allocation5]  }
  0x88   : > { %p1847_p9 = scmp.ne.s32.totalorder %s2200_s5, %s1846_s0  ;;  %s1851_s17 = sshll.u32 %s1951_s6, 4  ;;  %s1852_s17 = int_to_ptr.vmem [resolvable:$false] %s1851_s17 }
  0x89   : > { %s1853_s19 = scalar_lea.vmem %s1852_s17, 256  ;;  %p1854_p2 = scmp.lt.s32.totalorder %s2200_s5, %s1852_s17 }
  0x8a   : > { %p1849_p6 = pnand %p1847_p9, %p1807_p12  ;;  %p1855_p1 = scmp.lt.s32.totalorder %s1853_s19, %s1846_s0 }
  0x8c   : > { %p1850_p13 = pneg %p1849_p6  ;;  %p1856_p7 = por %p1855_p1, %p1854_p2 }
  0x8e   : > { %p1857_p10 = pnand %p1856_p7, %p1850_p13 }
  0x90   : > { %1860 = shalt.err (!%p1857_p10)
}
  0x91   : > { %s1952_s23 = smov 64   ;;  %s1953_s29 = smov 4  }
  0x92   : > { %1599 = dma.hbm_to_vmem [thread:$0]  (!%p2156_p11), %s2198_s13, 128, %s2200_s5, %s2204_s8, %s1952_s23, %s1952_s23, %s1953_s29  }
  0x93   : > { %388 = sbr.rel (%p2033_p3) target bundleno = 1494 (0x5d6), region = 56  ;;  %s2232_s2 = sand.u32 (!%p2033_p3), 1, %s1933_s10  }
  0x94   : > { %s1252_s25 = sshll.u32 (!%p2033_p3), %s2232_s2, 4  ;;  %s391_s28 = scalar_lea.sflag (!%p2033_p3), [#allocation3], %s2232_s2 }
  0x95   : > { %s2236_s20 = scalar_lea.vmem (!%p2033_p3), [#allocation2], %s1252_s25  ;;  %p2395_p12 = scmp.ne.s32.totalorder (!%p2033_p3), %s2386_s26, 0 }
  0x98   : > { %1904 = dma.done.wait (%p2395_p12), %s391_s28, 256  }
  0x99   : > { %1906 = vsyncadd (%p2395_p12), %s391_s28, 4294967040  ;;  %s399_s5 = sand.u32 1, %s2028_s15   ;;  %s1253_s8 = sshll.u32 %s2232_s2, 3 }
  0x9a   : > { %s400_s16 = scalar_lea.sflag [#allocation6], %s399_s5  ;;  %s2244_s24 = scalar_lea.vmem [#allocation5], %s1253_s8 }
  0x9b   : > { %1908 = dma.done.wait (%p2395_p12), %s400_s16, 128  }
  0x9c   : > { %1910 = vsyncadd (%p2395_p12), %s400_s16, 4294967168  ;;  %p2396_p3 = scmp.eq.s32.totalorder %s2028_s15, 0 }
  0x9e   : > { %1912 = dma.done.wait (%p2396_p3), [#allocation6], 2048   ;;  %p2397_p11 = pmov %p2396_p3 }
  0x9f   : > { %p2398_p5 = pmov %p2396_p3 }
  0xa0   : > { %1914 = vsyncadd (%p2397_p11), [#allocation6], 4294965248 }
  0xa1   : > { %1916 = dma.done.wait (%p2398_p5), [#allocation9], 4096   ;;  %p2399_p0 = pmov %p2396_p3 }
  0xa3   : > { %1918 = vsyncadd (%p2399_p0), [#allocation9], 4294963200  ;;  %p2400_p4 = pmov %p2399_p0 }
  0xa4   : > { %p2401_p8 = pmov %p2399_p0 }
  0xa5   : > { %1920 = dma.done.wait (%p2400_p4), [#allocation12], 4096  }
  0xa6   : > { %1922 = vsyncadd (%p2401_p8), [#allocation12], 4294963200  ;;  %v495_v0 = vld [vmem:[#allocation8 + $0x78] sm:$0xff]  ;;  %v494_v1 = vld [vmem:[#allocation8 + $0x70] sm:$0xff]  ;;  %v1954_v18 = vmov 0.0   ;;  %vm1955_vm0 = vmmov 0  }
  0xa7   : > { %1364 = vmatprep.subr.mxu0 %v495_v0  ;;  %v493_v2 = vld [vmem:[#allocation8 + $0x68] sm:$0xff]  ;;  %v492_v3 = vld [vmem:[#allocation8 + $0x60] sm:$0xff]  ;;  %v491_v5 = vld [vmem:[#allocation8 + $0x58] sm:$0xff]  ;;  %1399 = vmatprep.subr.bf16.mxu1 %v1954_v18  ;;  %vm469_vm1 = vcmask 130048   ;;  %s1266_s14 = sshll.u32 %s2028_s15, 4  ;;  %s461_s0 = scalar_lea.vmem [#allocation14], %s2232_s2 }
  0xa8   : > { %1365 = vmatpush3.msra.mxu0 %v495_v0  ;;  %v2263_v4 = vld [vmem:[%s2236_s20] sm:$0xff]  ;;  %v489_v7 = vld [vmem:[#allocation8 + $0x48] sm:$0xff]  ;;  %v487_v9 = vld [vmem:[#allocation8 + $0x38] sm:$0xff]  ;;  %1401 = vmatprep.mubr.msk.bf16.mxu1 %vm1955_vm0, %v1954_v18  ;;  %s1101_s6 = sshll.u32 %s461_s0, 4  ;;  %s1099_s23 = scalar_lea.hbm %s2365_s9, %s1266_s14  ;;  %s1102_s6 = int_to_ptr.vmem [resolvable:$true] %s1101_s6 }
  0xa9   : > { %1366 = vmatprep.subr.mxu0 %v494_v1  ;;  %1396 = vmatprep.mubr.f32.mxu0 %v2263_v4  ;;  %v490_v6 = vld [vmem:[#allocation8 + $0x50] sm:$0xff]  ;;  %v488_v8 = vld [vmem:[#allocation8 + $0x40] sm:$0xff]  ;;  %v485_v11 = vld [vmem:[#allocation8 + $0x28] sm:$0xff]  ;;  %s1089_s29 = scalar_lea.sflag [#allocation4], %s2232_s2  ;;  %s1861_s25 = scalar_lea.vmem %s1102_s6, 16 }
  0xaa   : > { %1367 = vmatpush3.msra.mxu0 %v494_v1  ;;  %v486_v10 = vld [vmem:[#allocation8 + $0x30] sm:$0xff]  ;;  %v484_v12 = vld [vmem:[#allocation8 + $0x20] sm:$0xff]  ;;  %v483_v13 = vld [vmem:[#allocation8 + $0x18] sm:$0xff]  ;;  %p1862_p9 = scmp.ne.s32.totalorder %s1102_s6, %s1861_s25  ;;  %p2402_p6 = scmp.ne.s32.totalorder %s2387_s27, 0 }
  0xab   : > { %1368 = vmatprep.subr.mxu0 %v493_v2  ;;  %v482_v14 = vld [vmem:[#allocation8 + $0x10] sm:$0xff]  ;;  %v481_v15 = vld [vmem:[#allocation8 + $0x8] sm:$0xff]  ;;  %v480_v16 = vld [vmem:[#allocation8] sm:$0xff]  ;;  %s1956_s28 = smov [#allocation14]  }
  0xac   : > { %1369 = vmatpush3.msra.mxu0 %v493_v2  ;;  %v2267_v17 = vld [vmem:[%s2236_s20 + $0x8] sm:$0xff]  ;;  %v2274_v19 = vld [vmem:[%s2244_s24] sm:$0xff]   ;;  %v635_v30 = vld [vmem:[#allocation7 + $0x60] sm:$0xff]  ;;  %p1863_p13 = pnand %p1862_p9, %p2402_p6  ;;  %s1865_s20 = sshll.u32 %s1956_s28, 4  ;;  %s1866_s20 = int_to_ptr.vmem [resolvable:$false] %s1865_s20 }
  0xad   : > { %1370 = vmatprep.subr.mxu0 %v492_v3  ;;  %v467_v20 = vunpack.c.l.bf16 %v2274_v19  ;;  %v468_v21 = vunpack.c.h.bf16 %v2274_v19  ;;  %v638_v27 = vld [vmem:[#allocation7 + $0x78] sm:$0xff]  ;;  %v637_v28 = vld [vmem:[#allocation7 + $0x70] sm:$0xff]  ;;  %v636_v29 = vld [vmem:[#allocation7 + $0x68] sm:$0xff]  ;;  %s1867_s15 = scalar_lea.vmem %s1866_s20, 32  ;;  %p1868_p1 = scmp.lt.s32.totalorder %s1102_s6, %s1866_s20 }
  0xae   : > { %1371 = vmatpush3.msra.mxu0 %v492_v3  ;;  %v634_v31 = vld [vmem:[#allocation7 + $0x58] sm:$0xff]  ;;  %v633_v32 = vld [vmem:[#allocation7 + $0x50] sm:$0xff]  ;;  %v632_v33 = vld [vmem:[#allocation7 + $0x48] sm:$0xff]  ;;  %p1864_p2 = pneg %p1863_p13  ;;  %p1869_p7 = scmp.lt.s32.totalorder %s1867_s15, %s1861_s25 }
  0xaf   : > { %1372 = vmatprep.subr.mxu0 %v491_v5  ;;  %v470_v22 = vsel %vm469_vm1, %v467_v20, 0.0  ;;  %v473_v23 = vsel %vm469_vm1, %v468_v21, 0.0  ;;  %v631_v34 = vld [vmem:[#allocation7 + $0x40] sm:$0xff]  ;;  %v630_v35 = vld [vmem:[#allocation7 + $0x38] sm:$0xff]  ;;  %v629_v36 = vld [vmem:[#allocation7 + $0x30] sm:$0xff] }
  0xb0   : > { %1373 = vmatpush3.msra.mxu0 %v491_v5  ;;  %471 = vadd.xlane.f32.xlu0 %v470_v22  ;;  %v628_v37 = vld [vmem:[#allocation7 + $0x28] sm:$0xff]  ;;  %v627_v38 = vld [vmem:[#allocation7 + $0x20] sm:$0xff]  ;;  %v626_v39 = vld [vmem:[#allocation7 + $0x18] sm:$0xff]  ;;  %p1870_p10 = por %p1869_p7, %p1868_p1 }
  0xb1   : > { %1374 = vmatprep.subr.mxu0 %v490_v6  ;;  %v625_v40 = vld [vmem:[#allocation7 + $0x10] sm:$0xff]  ;;  %v624_v41 = vld [vmem:[#allocation7 + $0x8] sm:$0xff]  ;;  %v623_v42 = vld [vmem:[#allocation7] sm:$0xff] }
  0xb2   : > { %1375 = vmatpush3.msra.mxu0 %v490_v6  ;;  %v740_v43 = vld [vmem:[#allocation11 + $0x78] sm:$0xff]  ;;  %v739_v44 = vld [vmem:[#allocation11 + $0x70] sm:$0xff]  ;;  %v738_v45 = vld [vmem:[#allocation11 + $0x68] sm:$0xff]  ;;  %p1871_p12 = pnand %p1870_p10, %p1864_p2 }
  0xb3   : > { %1376 = vmatprep.subr.mxu0 %v489_v7  ;;  %v737_v46 = vld [vmem:[#allocation11 + $0x60] sm:$0xff]  ;;  %v736_v47 = vld [vmem:[#allocation11 + $0x58] sm:$0xff]  ;;  %v735_v48 = vld [vmem:[#allocation11 + $0x50] sm:$0xff] }
  0xb4   : > { %1377 = vmatpush3.msra.mxu0 %v489_v7  ;;  %474 = vadd.xlane.f32.xlu0 %v473_v23  ;;  %v734_v49 = vld [vmem:[#allocation11 + $0x48] sm:$0xff]  ;;  %v733_v50 = vld [vmem:[#allocation11 + $0x40] sm:$0xff]  ;;  %v732_v51 = vld [vmem:[#allocation11 + $0x38] sm:$0xff] }
  0xb5   : > { %1378 = vmatprep.subr.mxu0 %v488_v8  ;;  %v731_v52 = vld [vmem:[#allocation11 + $0x30] sm:$0xff]  ;;  %v730_v53 = vld [vmem:[#allocation11 + $0x28] sm:$0xff]  ;;  %v729_v54 = vld [vmem:[#allocation11 + $0x20] sm:$0xff] }
  0xb6   : > { %1379 = vmatpush3.msra.mxu0 %v488_v8  ;;  %v728_v55 = vld [vmem:[#allocation11 + $0x18] sm:$0xff]  ;;  %v727_v56 = vld [vmem:[#allocation11 + $0x10] sm:$0xff]  ;;  %v726_v57 = vld [vmem:[#allocation11 + $0x8] sm:$0xff] }
  0xb7   : > { %1380 = vmatprep.subr.mxu0 %v487_v9  ;;  %v725_v58 = vld [vmem:[#allocation11] sm:$0xff]  ;;  %v875_v21 = vld [vmem:[#allocation10 + $0x78] sm:$0xff]  ;;  %v874_v22 = vld [vmem:[#allocation10 + $0x70] sm:$0xff] }
  0xb8   : > { %1381 = vmatpush3.msra.mxu0 %v487_v9  ;;  %v1261_v9 = vld [vmem:[%s2360_s4] ss:$0 sm:$0xff]  ;;  %v873_v23 = vld [vmem:[#allocation10 + $0x68] sm:$0xff] }
  0xb9   : > { %1382 = vmatprep.subr.mxu0 %v486_v10 }
  0xba   : > { %1383 = vmatpush3.msra.mxu0 %v486_v10 }
  0xbb   : > { %1384 = vmatprep.subr.mxu0 %v485_v11 }
  0xbc   : > { %1385 = vmatpush3.msra.mxu0 %v485_v11 }
  0xbd   : > { %1386 = vmatprep.subr.mxu0 %v484_v12 }
  0xbe   : > { %1387 = vmatpush3.msra.mxu0 %v484_v12 }
  0xbf   : > { %1388 = vmatprep.subr.mxu0 %v483_v13 }
  0xc0   : > { %1389 = vmatpush3.msra.mxu0 %v483_v13 }
  0xc1   : > { %1390 = vmatprep.subr.mxu0 %v482_v14 }
  0xc2   : > { %1391 = vmatpush3.msra.mxu0 %v482_v14 }
  0xc3   : > { %1392 = vmatprep.subr.mxu0 %v481_v15 }
  0xc4   : > { %1393 = vmatpush3.msra.mxu0 %v481_v15 }
  0xc5   : > { %1394 = vmatprep.subr.mxu0 %v480_v16 }
  0xc6   : > { %1395 = vmatpush3.msra.mxu0 %v480_v16 }
  0xc7   : > { %1397 = vmatmul.mubr.f32.vlgmr.msra.gmra.mxu0 %v2267_v17  ;;  %1440 = vmatprep.subr.mxu0 %v740_v43 }
  0xc8   : > { %1441 = vmatpush3.msra.mxu0 %v740_v43  ;;  %v977_v43 = vld [vmem:[#allocation13 + $0x40] sm:$0xff] }
  0xc9   : > { %1442 = vmatprep.subr.mxu0 %v739_v44 }
  0xca   : > { %1443 = vmatpush3.msra.mxu0 %v739_v44  ;;  %v976_v44 = vld [vmem:[#allocation13 + $0x38] sm:$0xff] }
  0xcb   : > { %1444 = vmatprep.subr.mxu0 %v738_v45 }
  0xcc   : > { %1445 = vmatpush3.msra.mxu0 %v738_v45  ;;  %v975_v45 = vld [vmem:[#allocation13 + $0x30] sm:$0xff] }
  0xcd   : > { %1446 = vmatprep.subr.mxu0 %v737_v46 }
  0xce   : > { %1447 = vmatpush3.msra.mxu0 %v737_v46  ;;  %v974_v46 = vld [vmem:[#allocation13 + $0x28] sm:$0xff] }
  0xcf   : > { %1448 = vmatprep.subr.mxu0 %v736_v47 }
  0xd0   : > { %1449 = vmatpush3.msra.mxu0 %v736_v47  ;;  %v973_v47 = vld [vmem:[#allocation13 + $0x20] sm:$0xff] }
  0xd1   : > { %1450 = vmatprep.subr.mxu0 %v735_v48 }
  0xd2   : > { %1451 = vmatpush3.msra.mxu0 %v735_v48  ;;  %v972_v48 = vld [vmem:[#allocation13 + $0x18] sm:$0xff] }
  0xd3   : > { %1452 = vmatprep.subr.mxu0 %v734_v49 }
  0xd4   : > { %1453 = vmatpush3.msra.mxu0 %v734_v49  ;;  %v971_v49 = vld [vmem:[#allocation13 + $0x10] sm:$0xff] }
  0xd5   : > { %1454 = vmatprep.subr.mxu0 %v733_v50 }
  0xd6   : > { %1455 = vmatpush3.msra.mxu0 %v733_v50  ;;  %v970_v50 = vld [vmem:[#allocation13 + $0x8] sm:$0xff] }
  0xd7   : > { %1456 = vmatprep.subr.mxu0 %v732_v51 }
  0xd8   : > { %1457 = vmatpush3.msra.mxu0 %v732_v51  ;;  %v969_v51 = vld [vmem:[#allocation13] sm:$0xff] }
  0xd9   : > { %1458 = vmatprep.subr.mxu0 %v731_v52 }
  0xda   : > { %1459 = vmatpush3.msra.mxu0 %v731_v52 }
  0xdb   : > { %1460 = vmatprep.subr.mxu0 %v730_v53 }
  0xdc   : > { %1461 = vmatpush3.msra.mxu0 %v730_v53 }
  0xdd   : > { %1462 = vmatprep.subr.mxu0 %v729_v54 }
  0xde   : > { %1463 = vmatpush3.msra.mxu0 %v729_v54 }
  0xdf   : > { %1464 = vmatprep.subr.mxu0 %v728_v55 }
  0xe0   : > { %1465 = vmatpush3.msra.mxu0 %v728_v55 }
  0xe1   : > { %1466 = vmatprep.subr.mxu0 %v727_v56 }
  0xe2   : > { %1467 = vmatpush3.msra.mxu0 %v727_v56 }
  0xe3   : > { %1468 = vmatprep.subr.mxu0 %v726_v57 }
  0xe4   : > { %1469 = vmatpush3.msra.mxu0 %v726_v57 }
  0xe5   : > { %1470 = vmatprep.subr.mxu0 %v725_v58 }
  0xe6   : > { %1471 = vmatpush3.msra.mxu0 %v725_v58 }
  0xe7   : > { %1516 = vmatprep.subr.mxu0 %v1954_v18 }
 0x139   : > { %v472_v60 = vpop.xlane.xlu0 %471 }
 0x13a   : > { %v476_v2 = vmax.f32 %v472_v60, 1.0  ;;  %v1263_v60 = vld [vmem:[%s2363_s7] ss:$0 sm:$0xff] }
 0x13d   : > { %v475_v0 = vpop.xlane.xlu0 %474 }
 0x13e   : > { %v477_v1 = vmax.f32 %v475_v0, 1.0 }
 0x140   : > { %1661 = vrcp.f32 %v477_v1 }
 0x141   : > { %1663 = vrcp.f32 %v476_v2 }
 0x14d   : > { %v2288_v3 = vpop.eup %1661 }
 0x187   : > { %v1398_v24 = vpop.f32.mrf.mxu0 }
 0x189   : > { %v562_v25 = vpop.f32.mrf.mxu0 }
 0x18a   : > { %v571_v26 = vpack.c.bf16 %v1398_v24, %v562_v25  ;;  %v872_v24 = vld [vmem:[#allocation10 + $0x60] sm:$0xff]  ;;  %v871_v25 = vld [vmem:[#allocation10 + $0x58] sm:$0xff] }
 0x18c   : > { %1400 = vmatpush3.bf16.msra.mxu1 %v571_v26  ;;  %v870_v26 = vld [vmem:[#allocation10 + $0x50] sm:$0xff] }
 0x18d   : > { %1405 = vmatprep.subr.mxu1 %v638_v27 }
 0x18f   : > { %1402 = vmatmul.mubr.msk.bf16.vlgmr.msra.gmra.mxu1 %vm469_vm1, %v2274_v19 }
 0x190   : > { %1406 = vmatpush3.msra.mxu1 %v638_v27  ;;  %1437 = vmatprep.mubr.f32.mxu1 %v2263_v4  ;;  %v2290_v4 = vpop.eup %1663  ;;  %v869_v27 = vld [vmem:[#allocation10 + $0x48] sm:$0xff] }
 0x191   : > { %1407 = vmatprep.subr.mxu1 %v637_v28 }
 0x192   : > { %1408 = vmatpush3.msra.mxu1 %v637_v28  ;;  %v868_v28 = vld [vmem:[#allocation10 + $0x40] sm:$0xff] }
 0x193   : > { %1409 = vmatprep.subr.mxu1 %v636_v29 }
 0x194   : > { %1410 = vmatpush3.msra.mxu1 %v636_v29  ;;  %v866_v29 = vld [vmem:[#allocation10 + $0x30] sm:$0xff] }
 0x195   : > { %1411 = vmatprep.subr.mxu1 %v635_v30 }
 0x196   : > { %1412 = vmatpush3.msra.mxu1 %v635_v30  ;;  %v865_v30 = vld [vmem:[#allocation10 + $0x28] sm:$0xff] }
 0x197   : > { %1413 = vmatprep.subr.mxu1 %v634_v31 }
 0x198   : > { %1414 = vmatpush3.msra.mxu1 %v634_v31  ;;  %v864_v31 = vld [vmem:[#allocation10 + $0x20] sm:$0xff] }
 0x199   : > { %1415 = vmatprep.subr.mxu1 %v633_v32 }
 0x19a   : > { %1416 = vmatpush3.msra.mxu1 %v633_v32  ;;  %v863_v32 = vld [vmem:[#allocation10 + $0x18] sm:$0xff] }
 0x19b   : > { %1417 = vmatprep.subr.mxu1 %v632_v33 }
 0x19c   : > { %1418 = vmatpush3.msra.mxu1 %v632_v33  ;;  %v862_v33 = vld [vmem:[#allocation10 + $0x10] sm:$0xff] }
 0x19d   : > { %1419 = vmatprep.subr.mxu1 %v631_v34 }
 0x19e   : > { %1420 = vmatpush3.msra.mxu1 %v631_v34  ;;  %v861_v34 = vld [vmem:[#allocation10 + $0x8] sm:$0xff] }
 0x19f   : > { %1421 = vmatprep.subr.mxu1 %v630_v35 }
 0x1a0   : > { %1422 = vmatpush3.msra.mxu1 %v630_v35  ;;  %v860_v35 = vld [vmem:[#allocation10] sm:$0xff] }
 0x1a1   : > { %1423 = vmatprep.subr.mxu1 %v629_v36 }
 0x1a2   : > { %1424 = vmatpush3.msra.mxu1 %v629_v36  ;;  %v984_v36 = vld [vmem:[#allocation13 + $0x78] sm:$0xff] }
 0x1a3   : > { %1425 = vmatprep.subr.mxu1 %v628_v37 }
 0x1a4   : > { %1426 = vmatpush3.msra.mxu1 %v628_v37  ;;  %v983_v37 = vld [vmem:[#allocation13 + $0x70] sm:$0xff] }
 0x1a5   : > { %1427 = vmatprep.subr.mxu1 %v627_v38 }
 0x1a6   : > { %1428 = vmatpush3.msra.mxu1 %v627_v38  ;;  %v982_v38 = vld [vmem:[#allocation13 + $0x68] sm:$0xff] }
 0x1a7   : > { %1429 = vmatprep.subr.mxu1 %v626_v39 }
 0x1a8   : > { %1430 = vmatpush3.msra.mxu1 %v626_v39  ;;  %v981_v39 = vld [vmem:[#allocation13 + $0x60] sm:$0xff] }
 0x1a9   : > { %1431 = vmatprep.subr.mxu1 %v625_v40 }
 0x1aa   : > { %1432 = vmatpush3.msra.mxu1 %v625_v40  ;;  %v980_v40 = vld [vmem:[#allocation13 + $0x58] sm:$0xff] }
 0x1ab   : > { %1433 = vmatprep.subr.mxu1 %v624_v41 }
 0x1ac   : > { %1434 = vmatpush3.msra.mxu1 %v624_v41  ;;  %v979_v41 = vld [vmem:[#allocation13 + $0x50] sm:$0xff] }
 0x1ad   : > { %1435 = vmatprep.subr.mxu1 %v623_v42 }
 0x1ae   : > { %1436 = vmatpush3.msra.mxu1 %v623_v42  ;;  %v978_v42 = vld [vmem:[#allocation13 + $0x48] sm:$0xff] }
 0x1af   : > { %1438 = vmatmul.mubr.f32.vlgmr.msra.gmra.mxu1 %v2267_v17  ;;  %1475 = vmatprep.subr.bf16.mxu1 %v1954_v18 }
 0x1b0   : > { %1477 = vmatprep.mubr.msk.bf16.mxu1 %vm1955_vm0, %v1954_v18 }
 0x24f   : > { %v614_v59 = vpop.f32.mrf.mxu1 }
 0x250   : > { %v621_v7 = vmul.f32 %v2290_v4, %v614_v59 }
 0x251   : > { %v1403_v61 = vpop.f32.mrf.mxu1 }
 0x253   : > { %v617_v62 = vpop.f32.mrf.mxu1 }
 0x254   : > { %v622_v5 = vmul.f32 %v2288_v3, %v617_v62 }
 0x255   : > { %v1404_v63 = vpop.f32.mrf.mxu1 }
 0x26f   : > { %v1439_v6 = vpop.f32.mrf.mxu1 }
 0x270   : > { %v711_v8 = vadd.f32 %v1439_v6, %v622_v5 }
 0x271   : > { %v705_v10 = vpop.f32.mrf.mxu1 }
 0x272   : > { %v706_v11 = vadd.f32 %v705_v10, %v621_v7  ;;  %v722_v12 = vadd.f32 %v1261_v9, %v711_v8  ;;  %v1056_v10 = vlaneseq }
 0x274   : > { %v721_v13 = vadd.f32 %v1261_v9, %v706_v11  ;;  %v724_v15 = vmax.f32 %v722_v12, 0.0  ;;  %v1057_v11 = vshrl.u32 %v1056_v10, 7 }
 0x276   : > { %v723_v14 = vmax.f32 %v721_v13, 0.0  ;;  %v1058_v12 = vsub.s32 0, %v1057_v11 }
 0x278   : > { %1472 = vmatprep.mubr.f32.mxu0 %v723_v14 }
 0x279   : > { %1473 = vmatmul.mubr.f32.vlgmr.msra.gmra.mxu0 %v724_v15 }
 0x27a   : > { %1548 = vmatprep.mubr.msk.f32.mxu0 %vm1955_vm0, %v1954_v18  ;;  %1517 = vmatpush3.msra.mxu0 %v984_v36 }
 0x27b   : > { %1518 = vmatprep.subr.mxu0 %v1954_v18 }
 0x27c   : > { %1519 = vmatpush3.msra.mxu0 %v983_v37 }
 0x27d   : > { %1520 = vmatprep.subr.mxu0 %v1954_v18 }
 0x27e   : > { %1521 = vmatpush3.msra.mxu0 %v982_v38 }
 0x27f   : > { %1522 = vmatprep.subr.mxu0 %v1954_v18 }
 0x280   : > { %1523 = vmatpush3.msra.mxu0 %v981_v39 }
 0x281   : > { %1524 = vmatprep.subr.mxu0 %v1954_v18 }
 0x282   : > { %1525 = vmatpush3.msra.mxu0 %v980_v40 }
 0x283   : > { %1526 = vmatprep.subr.mxu0 %v1954_v18 }
 0x284   : > { %1527 = vmatpush3.msra.mxu0 %v979_v41 }
 0x285   : > { %1528 = vmatprep.subr.mxu0 %v1954_v18 }
 0x286   : > { %1529 = vmatpush3.msra.mxu0 %v978_v42 }
 0x287   : > { %1530 = vmatprep.subr.mxu0 %v1954_v18 }
 0x288   : > { %1531 = vmatpush3.msra.mxu0 %v977_v43 }
 0x289   : > { %1532 = vmatprep.subr.mxu0 %v1954_v18 }
 0x28a   : > { %1533 = vmatpush3.msra.mxu0 %v976_v44 }
 0x28b   : > { %1534 = vmatprep.subr.mxu0 %v1954_v18 }
 0x28c   : > { %1535 = vmatpush3.msra.mxu0 %v975_v45 }
 0x28d   : > { %1536 = vmatprep.subr.mxu0 %v1954_v18 }
 0x28e   : > { %1537 = vmatpush3.msra.mxu0 %v974_v46 }
 0x28f   : > { %1538 = vmatprep.subr.mxu0 %v1954_v18 }
 0x290   : > { %1539 = vmatpush3.msra.mxu0 %v973_v47 }
 0x291   : > { %1540 = vmatprep.subr.mxu0 %v1954_v18 }
 0x292   : > { %1541 = vmatpush3.msra.mxu0 %v972_v48 }
 0x293   : > { %1542 = vmatprep.subr.mxu0 %v1954_v18 }
 0x294   : > { %1543 = vmatpush3.msra.mxu0 %v971_v49 }
 0x295   : > { %1544 = vmatprep.subr.mxu0 %v1954_v18 }
 0x296   : > { %1545 = vmatpush3.msra.mxu0 %v970_v50 }
 0x297   : > { %1546 = vmatprep.subr.mxu0 %v1954_v18 }
 0x298   : > { %1547 = vmatpush3.msra.mxu0 %v969_v51 }
 0x339   : > { %v1474_v16 = vpop.f32.mrf.mxu0 }
 0x33b   : > { %v807_v17 = vpop.f32.mrf.mxu0 }
 0x33c   : > { %v816_v20 = vpack.c.bf16 %v1474_v16, %v807_v17 }
 0x33e   : > { %1476 = vmatpush3.bf16.msra.mxu1 %v816_v20 }
 0x33f   : > { %1481 = vmatprep.subr.mxu1 %v875_v21 }
 0x341   : > { %1478 = vmatmul.mubr.msk.bf16.vlgmr.msra.gmra.mxu1 %vm469_vm1, %v2274_v19  ;;  %v867_v19 = vld [vmem:[#allocation10 + $0x38] sm:$0xff] }
 0x342   : > { %1482 = vmatpush3.msra.mxu1 %v875_v21  ;;  %1513 = vmatprep.mubr.f32.mxu1 %v723_v14 }
 0x343   : > { %1483 = vmatprep.subr.mxu1 %v874_v22 }
 0x344   : > { %1484 = vmatpush3.msra.mxu1 %v874_v22 }
 0x345   : > { %1485 = vmatprep.subr.mxu1 %v873_v23 }
 0x346   : > { %1486 = vmatpush3.msra.mxu1 %v873_v23 }
 0x347   : > { %1487 = vmatprep.subr.mxu1 %v872_v24 }
 0x348   : > { %1488 = vmatpush3.msra.mxu1 %v872_v24 }
 0x349   : > { %1489 = vmatprep.subr.mxu1 %v871_v25 }
 0x34a   : > { %1490 = vmatpush3.msra.mxu1 %v871_v25 }
 0x34b   : > { %1491 = vmatprep.subr.mxu1 %v870_v26 }
 0x34c   : > { %1492 = vmatpush3.msra.mxu1 %v870_v26 }
 0x34d   : > { %1493 = vmatprep.subr.mxu1 %v869_v27 }
 0x34e   : > { %1494 = vmatpush3.msra.mxu1 %v869_v27 }
 0x34f   : > { %1495 = vmatprep.subr.mxu1 %v868_v28 }
 0x350   : > { %1496 = vmatpush3.msra.mxu1 %v868_v28 }
 0x351   : > { %1497 = vmatprep.subr.mxu1 %v867_v19 }
 0x352   : > { %1498 = vmatpush3.msra.mxu1 %v867_v19 }
 0x353   : > { %1499 = vmatprep.subr.mxu1 %v866_v29 }
 0x354   : > { %1500 = vmatpush3.msra.mxu1 %v866_v29 }
 0x355   : > { %1501 = vmatprep.subr.mxu1 %v865_v30 }
 0x356   : > { %1502 = vmatpush3.msra.mxu1 %v865_v30 }
 0x357   : > { %1503 = vmatprep.subr.mxu1 %v864_v31 }
 0x358   : > { %1504 = vmatpush3.msra.mxu1 %v864_v31 }
 0x359   : > { %1505 = vmatprep.subr.mxu1 %v863_v32 }
 0x35a   : > { %1506 = vmatpush3.msra.mxu1 %v863_v32 }
 0x35b   : > { %1507 = vmatprep.subr.mxu1 %v862_v33 }
 0x35c   : > { %1508 = vmatpush3.msra.mxu1 %v862_v33 }
 0x35d   : > { %1509 = vmatprep.subr.mxu1 %v861_v34 }
 0x35e   : > { %1510 = vmatpush3.msra.mxu1 %v861_v34 }
 0x35f   : > { %1511 = vmatprep.subr.mxu1 %v860_v35 }
 0x360   : > { %1512 = vmatpush3.msra.mxu1 %v860_v35 }
 0x361   : > { %1514 = vmatmul.mubr.f32.vlgmr.msra.gmra.mxu1 %v724_v15 }
 0x401   : > { %v851_v52 = vpop.f32.mrf.mxu1 }
 0x402   : > { %v858_v58 = vmul.f32 %v2290_v4, %v851_v52 }
 0x403   : > { %v1479_v53 = vpop.f32.mrf.mxu1 }
 0x405   : > { %v854_v54 = vpop.f32.mrf.mxu1 }
 0x406   : > { %v859_v56 = vmul.f32 %v2288_v3, %v854_v54 }
 0x407   : > { %v1480_v55 = vpop.f32.mrf.mxu1 }
 0x421   : > { %v1515_v57 = vpop.f32.mrf.mxu1 }
 0x422   : > { %v948_v59 = vadd.f32 %v1515_v57, %v859_v56 }
 0x423   : > { %v942_v61 = vpop.f32.mrf.mxu1 }
 0x424   : > { %v943_v62 = vadd.f32 %v942_v61, %v858_v58  ;;  %v959_v63 = vadd.f32 %v1263_v60, %v948_v59 }
 0x426   : > { %v958_v0 = vadd.f32 %v1263_v60, %v943_v62 }
 0x428   : > { %v960_v18 = vadd.f32 %v959_v63, %v958_v0 }
 0x42a   : > { %v961_v1 = vrot.slane %v960_v18, 4 }
 0x42c   : > { %v962_v2 = vadd.f32 %v961_v1, %v960_v18 }
 0x42e   : > { %v963_v5 = vrot.slane %v962_v2, 2 }
 0x430   : > { %v964_v6 = vadd.f32 %v963_v5, %v962_v2 }
 0x432   : > { %v965_v7 = vrot.slane %v964_v6, 1 }
 0x434   : > { %v966_v8 = vadd.f32 %v965_v7, %v964_v6 }
 0x436   : > { %v968_v3 = vmul.f32 0.0625, %v966_v8 }
 0x438   : > { %1549 = vmatmul.mubr.f32.vlgmr.msra.gmra.mxu0 %v968_v3 }
 0x4f8   : > { %v1051_v9 = vpop.f32.mrf.mxu0 }
 0x4f9   : > { %1665 = vtanh.f32 %v1051_v9 }
 0x4fa   : > { %v1550_v4 = vpop.f32.mrf.mxu0 }
 0x506   : > { %v1666_v13 = vpop.eup %1665 }
 0x507   : > { %v1059_v14 = vrot.slane %v1666_v13, %v1058_v12 }
 0x509   : > { %v1060_v15 = vmul.f32 %v1059_v14, %v958_v0  ;;  %v1061_v16 = vmul.f32 %v1059_v14, %v959_v63 }
 0x50b   : > { %1062 = vadd.xlane.f32.xlu1 %v1060_v15 }
 0x50f   : > { %1064 = vadd.xlane.f32.xlu1 %v1061_v16 }
 0x594   : > { %v1063_v17 = vpop.xlane.xlu1 %1062 }
 0x595   : > { %v1264_v20 = vmul.f32 -1.442695, %v1063_v17 }
 0x597   : > { %1667 = vpow2.f32 %v1264_v20 }
 0x598   : > { %v1065_v21 = vpop.xlane.xlu1 %1064 }
 0x599   : > { %v1265_v22 = vmul.f32 -1.442695, %v1065_v21 }
 0x59b   : > { %1669 = vpow2.f32 %v1265_v22 }
 0x5a4   : > { %v1668_v23 = vpop.eup %1667 }
 0x5a5   : > { %v1072_v24 = vadd.f32 1.0, %v1668_v23 }
 0x5a7   : > { %1671 = vrcp.f32 %v1072_v24 }
 0x5a8   : > { %v1670_v25 = vpop.eup %1669 }
 0x5a9   : > { %v1073_v26 = vadd.f32 1.0, %v1670_v25 }
 0x5ab   : > { %1673 = vrcp.f32 %v1073_v26 }
 0x5b4   : > { %v1672_v27 = vpop.eup %1671 }
 0x5b5   : > { %v1078_v19 = vmul.f32 %v1672_v27, %v958_v0 }
 0x5b8   : > { %v1674_v28 = vpop.eup %1673 }
 0x5b9   : > { %v1079_v29 = vmul.f32 %v1674_v28, %v959_v63 }
 0x5bb   : > { %v1080_v30 = vadd.f32 %v1079_v29, %v1078_v19 }
 0x5bd   : > { %v1081_v31 = vrot.slane %v1080_v30, 4 }
 0x5bf   : > { %v1082_v32 = vadd.f32 %v1081_v31, %v1080_v30 }
 0x5c1   : > { %v1083_v33 = vrot.slane %v1082_v32, 2 }
 0x5c3   : > { %v1084_v34 = vadd.f32 %v1083_v33, %v1082_v32 }
 0x5c5   : > { %v1085_v35 = vrot.slane %v1084_v34, 1 }
 0x5c7   : > { %v1086_v36 = vadd.f32 %v1085_v35, %v1084_v34 }
 0x5c9   : > { %1087 = vst [vmem:[%s461_s0] sm:$0x1] %v1086_v36 }
 0x5ca   : > { %1874 = shalt.err (!%p1871_p12)
}
 0x5cb   : > { %s1875_s5 = scalar_lea.hbm %s1099_s23, 16  ;;  %s1879_s16 = scalar_lea.hbm %s2365_s9, 128 }
 0x5cc   : > { %p1876_p3 = scmp.ne.s32.totalorder %s1099_s23, %s1875_s5  ;;  %p1880_p0 = scmp.lt.s32.totalorder %s1099_s23, %s2365_s9 }
 0x5cd   : > { %p1881_p4 = scmp.lt.s32.totalorder %s1879_s16, %s1875_s5 }
 0x5ce   : > { %p1877_p11 = pnand %p1876_p3, %p2402_p6 }
 0x5cf   : > { %p1882_p8 = por %p1881_p4, %p1880_p0 }
 0x5d0   : > { %p1878_p5 = pneg %p1877_p11 }
 0x5d2   : > { %p1883_p9 = pnand %p1882_p8, %p1878_p5 }
 0x5d4   : > { %1886 = shalt.err (!%p1883_p9)
}
 0x5d5   : > { %1575 = dma.vmem_to_hbm [thread:$0]  (%p2402_p6), %s1102_s6, 16, %s1099_s23, %s1089_s29  }
 0x5d6 PF: > { %p1615_p13 = scmp.ge.s32.totalorder %s1941_s12, 2  ;;  %s1113_s13 = sand.u32 1, %s1929_s30  }
 0x5d7   : > { %p2403_p2 = scmp.ne.s32.totalorder %s2388_s21, 0  ;;  %s1114_s18 = scalar_lea.sflag [#allocation4], %s1113_s13 }
 0x5d9   : > { %p1601_p1 = pnand %p1615_p13, %p2403_p2 }
 0x5db   : > { %p1602_p7 = pneg %p1601_p1 }
 0x5dd   : > { %1924 = dma.done.wait (%p1602_p7), %s1114_s18, 16  }
 0x5de   : > { %1926 = vsyncadd (%p1602_p7), %s1114_s18, 4294967280  ;;  %s2404_s3 = sld [smem:[#allocation21_spill]]  ;;  %p27_p10 = scmp.ge.s32.totalorder %s2117_s22, 10  }
 0x5df   : > { %s2405_s30 = smov %s1933_s10  ;;  %s2406_s10 = smov %s1937_s11 }
 0x5e0   : > { %s2408_s12 = smov %s2117_s22  ;;  %29 = sbr.rel (!%p27_p10) target bundleno = 16 (0x10), region = 134 }
 0x5e4   : > { %s2407_s11 = smov %s2404_s3 }
 0x5e5   :  { %1118 = vsyncpa [#allocation3], 1 }
 0x5e6   :  { %1120 = vsyncpa [#allocation3 + $0x1], 1 }
 0x5e7   :  { %1121 = vsyncpa [#allocation6], 1 }
 0x5e8   :  { %1123 = vsyncpa [#allocation6 + $0x1], 1 }
 0x5e9   :  { %1124 = vsyncpa [#allocation9], 1 }
 0x5ea   :  { %1125 = vsyncpa [#allocation12], 1 }
 0x5eb   :  { %1126 = vsyncpa [#allocation4], 1 }
 0x5ec   :  { %1128 = vsyncpa [#allocation4 + $0x1], 1 }

</bundles_post_ra>
